<compile_context>
chip_gen: v7x
topology: tpu7x:2x2x1
jax: 0.10.0
libtpu: 0.0.40
codegen_flags: <defaults>
</compile_context>

<pallas_src>
import functools
import math

import jax
import jax.numpy as jnp
from jax.experimental import pallas as pl
from jax.experimental.pallas import tpu as pltpu


def _head_kernel(h_ref, gamma_ref, beta_ref, w1_ref, b1_ref, w2_ref, b2_ref,
                 pool_ref, out_ref, acc_ref, *, l_total):
    l = pl.program_id(1)

    tb, n, tl, d = h_ref.shape
    rows_pp = tb * n

    @pl.when(l == 0)
    def _():
        acc_ref[...] = jnp.zeros_like(acc_ref)

    # ---- streaming token reduction (hot path, VALU-only) --------------------
    # 16-token chunks (= one bf16 sublane tile); cast + add, sublane-preserving.
    n_full = tl // 16

    if n_full > 0 and n_full <= 8:
        # Short trip count: fully unrolled, static (tile-aligned) slices.
        for k in range(n_full):
            c = h_ref[:, :, k * 16:(k + 1) * 16, :].astype(jnp.float32)
            c = c.reshape(rows_pp, 16, d)
            acc_ref[...] += c[:, :8, :] + c[:, 8:, :]
    elif n_full > 8:
        # Long trip count: real loop bounds vreg live ranges.
        @pl.loop(0, n_full)
        def _(k):
            start = pl.multiple_of(k * 16, 16)
            c = h_ref[:, :, pl.ds(start, 16), :].astype(jnp.float32)
            c = c.reshape(rows_pp, 16, d)
            acc_ref[...] += c[:, :8, :] + c[:, 8:, :]

    rem = tl - n_full * 16
    if rem:
        # Rare tail (tl not a multiple of 16): small cross-sublane sum is fine.
        tail = h_ref[:, :, n_full * 16:, :].astype(jnp.float32)
        tail = tail.reshape(rows_pp, rem, d)
        acc_ref[:, :1, :] += jnp.sum(tail, axis=1, keepdims=True)

    # ---- epilogue: LayerNorm -> Linear+GELU -> seq-mean -> class head -------
    @pl.when(l == pl.num_programs(1) - 1)
    def _():
        # Fold the 8 sublane partial sums, then torch.mean over tokens.
        rows = jnp.sum(acc_ref[...], axis=1) * jnp.float32(1.0 / l_total)

        # nn.LayerNorm(D), eps=1e-5, biased variance.
        mu = jnp.mean(rows, axis=-1, keepdims=True)
        xc = rows - mu
        var = jnp.mean(xc * xc, axis=-1, keepdims=True)
        normed = xc * jax.lax.rsqrt(var + 1e-5) * gamma_ref[0] + beta_ref[0]

        # nn.Linear(D, 512) followed by exact (erf-based) nn.GELU().
        h = jnp.dot(normed.astype(w1_ref.dtype), w1_ref[...],
                    preferred_element_type=jnp.float32) + b1_ref[0]
        inv_sqrt2 = jnp.float32(1.0 / math.sqrt(2.0))
        feats = 0.5 * h * (1.0 + jax.lax.erf(h * inv_sqrt2))       # (TB*N, H)

        # torch.mean(features, dim=1): mean over the N sequences of a sample,
        # done as a pooling matmul with a precomputed mixing matrix.
        agg = jnp.dot(pool_ref[...], feats,
                      preferred_element_type=jnp.float32)          # (TB, H)

        # class_head: nn.Linear(512, C) against lane-dense (padded) weights.
        logits = jnp.dot(agg.astype(w2_ref.dtype), w2_ref[...],
                         preferred_element_type=jnp.float32) + b2_ref[0]
        out_ref[0] = logits.astype(out_ref.dtype)


def _divisors(n):
    return [d for d in range(1, n + 1) if n % d == 0]


def esmc_pro_classifier_head(hiddens, gamma, beta, w1, b1, w2, b2, *,
                             tb=None, tl=None, mxu_dtype=jnp.bfloat16,
                             vmem_limit_bytes=None):
    """hiddens: [B, N, L, D] (bf16 or f32); returns logits [B, num_classes]."""
    B, N, L, D = hiddens.shape
    H = w1.shape[1]
    C = w2.shape[1]
    itemsize = hiddens.dtype.itemsize
    mxu_itemsize = jnp.dtype(mxu_dtype).itemsize

    # Lane-dense output: pad num_classes to a multiple of 128 (sliced outside).
    c_pad = ((C + 127) // 128) * 128

    # ---- VMEM capacity & per-block streaming budget --------------------------
    try:
        vmem_cap = int(pltpu.get_tpu_info().vmem_capacity_bytes)
    except Exception:
        vmem_cap = 64 << 20          # conservative: v7x per-TC VMEM
    cap = max(min(vmem_cap - (8 << 20), 100 << 20), 16 << 20)

    # Constant (weight/param) inputs; the pipeline double-buffers them.
    param_bytes = (2 * D * 4                      # gamma, beta (f32)
                   + D * H * mxu_itemsize         # w1
                   + H * 4                        # b1 (f32)
                   + H * c_pad * mxu_itemsize     # w2 (padded)
                   + c_pad * 4)                   # b2 (padded, f32)
    reserve = 2 * param_bytes + (4 << 20)         # + margin for acc/out/internal
    max_block = (24 << 20) if cap >= (96 << 20) else (14 << 20)
    stream_budget = min(max_block, max((cap - reserve) // 2, 1 << 20))

    # ---- tile selection -------------------------------------------------------
    if tb is None:
        feasible = [d for d in _divisors(B)
                    if (B == 1 or B // d >= 2)          # keep both TCs busy
                    and d * N * min(L, 16) * D * itemsize <= stream_budget]
        even = [d for d in feasible if (B // d) % 2 == 0]
        if even:
            tb = max(even)
        elif feasible:
            tb = max(feasible)
        else:
            tb = 1
    assert B % tb == 0, (B, tb)

    if tl is None:
        divs = _divisors(L)
        fits = lambda d: tb * N * d * D * itemsize <= stream_budget
        cand = [d for d in divs if d % 16 == 0 and fits(d)]
        if not cand:
            cand = [d for d in divs if fits(d)]
        tl = max(cand) if cand else min(divs)
    assert L % tl == 0, (L, tl)

    rows_pp = tb * N

    # ---- parameter prep -------------------------------------------------------
    w1c = w1.astype(mxu_dtype)
    w2p = jnp.zeros((H, c_pad), mxu_dtype).at[:, :C].set(w2.astype(mxu_dtype))
    b2p = jnp.zeros((1, c_pad), jnp.float32).at[0, :C].set(b2.astype(jnp.float32))
    gamma2 = gamma.reshape(1, D).astype(jnp.float32)
    beta2 = beta.reshape(1, D).astype(jnp.float32)
    b1_2 = b1.reshape(1, H).astype(jnp.float32)

    # Pooling matrix for the per-sample mean over N sequences (rows of a
    # sample are contiguous in the (TB*N, H) feature matrix).
    sample = jnp.arange(rows_pp, dtype=jnp.int32) // N
    pool = (sample[None, :] == jnp.arange(tb, dtype=jnp.int32)[:, None]
            ).astype(jnp.float32) * jnp.float32(1.0 / N)            # (TB, TB*N)

    # ---- explicit scoped-VMEM limit ------------------------------------------
    if vmem_limit_bytes is None:
        block_bytes = tb * N * tl * D * itemsize
        acc_bytes = rows_pp * 8 * D * 4
        out_bytes = tb * c_pad * 4
        pool_bytes = tb * rows_pp * 4
        needed = (2 * block_bytes + 2 * (param_bytes + pool_bytes)
                  + acc_bytes + 2 * out_bytes + (4 << 20))
        vmem_limit_bytes = int(min(max(needed, 32 << 20), vmem_cap))

    # ---- cost estimate (HBM-bound streaming + tiny MXU epilogue) ---------------
    ce = pl.CostEstimate(
        flops=int(2 * B * N * D * H + 2 * B * N * H + 2 * B * H * c_pad),
        transcendentals=int(B * N * H),
        bytes_accessed=int(B * N * L * D * itemsize + param_bytes + B * c_pad * 4),
    )

    full = lambda shape: pl.BlockSpec(shape, lambda b, l, _s=len(shape): (0,) * _s)
    kernel = functools.partial(_head_kernel, l_total=L)

    out = pl.pallas_call(
        kernel,
        out_shape=jax.ShapeDtypeStruct((B // tb, tb, c_pad), jnp.float32),
        grid=(B // tb, L // tl),
        in_specs=[
            pl.BlockSpec((tb, N, tl, D), lambda b, l: (b, 0, l, 0)),
            full((1, D)),            # layernorm gamma
            full((1, D)),            # layernorm beta
            full((D, H)),            # feat_proj linear weight (in, out)
            full((1, H)),            # feat_proj linear bias
            full((H, c_pad)),        # class_head weight (padded, lane-dense)
            full((1, c_pad)),        # class_head bias (padded)
            full((tb, rows_pp)),     # per-sample mean pooling matrix
        ],
        out_specs=pl.BlockSpec((1, tb, c_pad), lambda b, l: (b, 0, 0)),
        scratch_shapes=[pltpu.VMEM((rows_pp, 8, D), jnp.float32)],
        compiler_params=pltpu.CompilerParams(
            dimension_semantics=("parallel", "arbitrary"),
            vmem_limit_bytes=int(vmem_limit_bytes)),
        cost_estimate=ce,
    )(hiddens, gamma2, beta2, w1c, b1_2, w2p, b2p, pool)

    return out.reshape(B, c_pad)[:, :C]


def _reference(hiddens, gamma, beta, w1, b1, w2, b2):
    x = hiddens.astype(jnp.float32)
    seq_feats = jnp.mean(x, axis=2)                               # (B, N, D)
    mu = jnp.mean(seq_feats, axis=-1, keepdims=True)
    var = jnp.mean((seq_feats - mu) ** 2, axis=-1, keepdims=True)
    normed = (seq_feats - mu) / jnp.sqrt(var + 1e-5) * gamma + beta
    h = normed @ w1 + b1
    feats = 0.5 * h * (1.0 + jax.lax.erf(h / jnp.sqrt(2.0)))      # (B, N, 512)
    agg = jnp.mean(feats, axis=1)                                 # (B, 512)
    return agg @ w2 + b2                                          # (B, C)


if __name__ == "__main__":
    B, N, L, D = 4, 4, 192, 64    # batch, seqs/sample, tokens, embed_dim
    H, C = 512, 4                 # feat_proj width, num_classes

    key = jax.random.PRNGKey(0)
    k_h, k_g, k_be, k_w1, k_b1, k_w2, k_b2 = jax.random.split(key, 7)

    # Backbone last-layer hidden states in bf16 (backbone output dtype).
    hiddens = jax.random.normal(k_h, (B, N, L, D), jnp.float32).astype(jnp.bfloat16)

    # Deterministic synthetic parameters (shapes per module __init__), f32.
    gamma = 1.0 + 0.1 * jax.random.normal(k_g, (D,), jnp.float32)
    beta = 0.05 * jax.random.normal(k_be, (D,), jnp.float32)
    w1 = jax.random.normal(k_w1, (D, H), jnp.float32) * (1.0 / math.sqrt(D))
    b1 = jax.random.normal(k_b1, (H,), jnp.float32) * 0.01
    w2 = jax.random.normal(k_w2, (H, C), jnp.float32) * (1.0 / math.sqrt(H))
    b2 = jax.random.normal(k_b2, (C,), jnp.float32) * 0.01

    ref = _reference(hiddens, gamma, beta, w1, b1, w2, b2)

    # 1) Exactness path: f32 MXU inputs, explicit small tiles -> grid (2, 12):
    #    exercises multi-step token streaming (unrolled chunk path), the
    #    accumulator init/finalize, and the parallel batch axis.
    logits_f32 = esmc_pro_classifier_head(hiddens, gamma, beta, w1, b1, w2, b2,
                                          tb=2, tl=16, mxu_dtype=jnp.float32)
    logits_f32 = jax.block_until_ready(logits_f32)
    assert logits_f32.shape == (B, C), logits_f32.shape
    assert jnp.allclose(logits_f32, ref, atol=2e-3, rtol=2e-3), (logits_f32, ref)

    # 2) Performance path (defaults): auto tiles (large token chunk -> the
    #    pl.loop streaming path) and bf16 MXU weights with f32 accumulation.
    logits = jax.block_until_ready(
        esmc_pro_classifier_head(hiddens, gamma, beta, w1, b1, w2, b2))
    assert logits.shape == (B, C), logits.shape
    assert jnp.allclose(logits, ref, atol=3e-2, rtol=3e-2), (logits, ref)

    print("KERNEL_OK")
</pallas_src>

<mosaic_0001>
module attributes {stable_mosaic.version = 11 : i64} {
  func.func @_head_kernel(%arg0: i32, %arg1: i32, %arg2: memref<2x4x16x64xbf16, #tpu.memory_space<vmem>>, %arg3: memref<1x64xf32, #tpu.memory_space<vmem>>, %arg4: memref<1x64xf32, #tpu.memory_space<vmem>>, %arg5: memref<64x512xf32, #tpu.memory_space<vmem>>, %arg6: memref<1x512xf32, #tpu.memory_space<vmem>>, %arg7: memref<512x128xf32, #tpu.memory_space<vmem>>, %arg8: memref<1x128xf32, #tpu.memory_space<vmem>>, %arg9: memref<2x8xf32, #tpu.memory_space<vmem>>, %arg10: memref<1x2x128xf32, #tpu.memory_space<vmem>>, %arg11: memref<8x8x64xf32, #tpu.memory_space<vmem>>) attributes {dimension_semantics = [#tpu.dimension_semantics<parallel>, #tpu.dimension_semantics<arbitrary>], iteration_bounds = array<i64: 2, 12>, scalar_prefetch = 0 : i64, scratch_operands = 1 : i64, tpu.core_type = #tpu.core_type<tc>, window_params = [{transform_indices = @transform_0, window_bounds = array<i64: 2, 4, 16, 64>}, {pipeline_mode = #tpu.pipeline_mode<synchronous>, transform_indices = @transform_1, window_bounds = array<i64: 1, 64>}, {pipeline_mode = #tpu.pipeline_mode<synchronous>, transform_indices = @transform_2, window_bounds = array<i64: 1, 64>}, {pipeline_mode = #tpu.pipeline_mode<synchronous>, transform_indices = @transform_3, window_bounds = array<i64: 64, 512>}, {pipeline_mode = #tpu.pipeline_mode<synchronous>, transform_indices = @transform_4, window_bounds = array<i64: 1, 512>}, {pipeline_mode = #tpu.pipeline_mode<synchronous>, transform_indices = @transform_5, window_bounds = array<i64: 512, 128>}, {pipeline_mode = #tpu.pipeline_mode<synchronous>, transform_indices = @transform_6, window_bounds = array<i64: 1, 128>}, {pipeline_mode = #tpu.pipeline_mode<synchronous>, transform_indices = @transform_7, window_bounds = array<i64: 2, 8>}, {transform_indices = @transform_8, window_bounds = array<i64: 1, 2, 128>}]} {
    %c0_i32 = arith.constant 0 : i32
    %0 = arith.cmpi eq, %arg1, %c0_i32 : i32
    %1 = arith.extui %0 : i1 to i32
    %c0_i32_0 = arith.constant 0 : i32
    %2 = arith.cmpi ne, %1, %c0_i32_0 : i32
    scf.if %2 {
      %cst = arith.constant 0.000000e+00 : f32
      %15 = vector.broadcast %cst : f32 to vector<8x8x64xf32>
      %c0_11 = arith.constant 0 : index
      %c0_12 = arith.constant 0 : index
      %c0_13 = arith.constant 0 : index
      %16 = vector.load %arg11[%c0_11, %c0_12, %c0_13] : memref<8x8x64xf32, #tpu.memory_space<vmem>>, vector<8x8x64xf32>
      tpu.vector_store %arg11[%c0_11, %c0_12, %c0_13], %15 {strides = array<i32>} : memref<8x8x64xf32, #tpu.memory_space<vmem>>, vector<8x8x64xf32>,
    } else {
    }
    %c0 = arith.constant 0 : index
    %c0_1 = arith.constant 0 : index
    %c0_2 = arith.constant 0 : index
    %c0_3 = arith.constant 0 : index
    %3 = vector.load %arg2[%c0, %c0_1, %c0_2, %c0_3] : memref<2x4x16x64xbf16, #tpu.memory_space<vmem>>, vector<2x4x16x64xbf16>
    %4 = arith.extf %3 : vector<2x4x16x64xbf16> to vector<2x4x16x64xf32>
    %5 = vector.shape_cast %4 : vector<2x4x16x64xf32> to vector<8x16x64xf32>
    %c0_4 = arith.constant 0 : index
    %c0_5 = arith.constant 0 : index
    %c0_6 = arith.constant 0 : index
    %6 = vector.load %arg11[%c0_4, %c0_5, %c0_6] : memref<8x8x64xf32, #tpu.memory_space<vmem>>, vector<8x8x64xf32>
    %7 = vector.extract_strided_slice %5 {offsets = [0, 0, 0], sizes = [8, 8, 64], strides = [1, 1, 1]} : vector<8x16x64xf32> to vector<8x8x64xf32>
    %8 = vector.extract_strided_slice %5 {offsets = [0, 8, 0], sizes = [8, 8, 64], strides = [1, 1, 1]} : vector<8x16x64xf32> to vector<8x8x64xf32>
    %9 = arith.addf %7, %8 : vector<8x8x64xf32>
    %10 = arith.addf %6, %9 : vector<8x8x64xf32>
    %c0_7 = arith.constant 0 : index
    %c0_8 = arith.constant 0 : index
    %c0_9 = arith.constant 0 : index
    %11 = vector.load %arg11[%c0_7, %c0_8, %c0_9] : memref<8x8x64xf32, #tpu.memory_space<vmem>>, vector<8x8x64xf32>
    tpu.vector_store %arg11[%c0_7, %c0_8, %c0_9], %10 {strides = array<i32>} : memref<8x8x64xf32, #tpu.memory_space<vmem>>, vector<8x8x64xf32>,
    %c11_i32 = arith.constant 11 : i32
    %12 = arith.cmpi eq, %arg1, %c11_i32 : i32
    %13 = arith.extui %12 : i1 to i32
    %c0_i32_10 = arith.constant 0 : i32
    %14 = arith.cmpi ne, %13, %c0_i32_10 : i32
    scf.if %14 {
      %c0_11 = arith.constant 0 : index
      %c0_12 = arith.constant 0 : index
      %c0_13 = arith.constant 0 : index
      %15 = vector.load %arg11[%c0_11, %c0_12, %c0_13] : memref<8x8x64xf32, #tpu.memory_space<vmem>>, vector<8x8x64xf32>
      %cst = arith.constant dense<0.000000e+00> : vector<8x64xf32>
      %16 = vector.multi_reduction <add>, %15, %cst [1] : vector<8x8x64xf32> to vector<8x64xf32>
      %cst_14 = arith.constant 0.00520833349 : f32
      %17 = vector.broadcast %cst_14 : f32 to vector<8x64xf32>
      %18 = arith.mulf %16, %17 : vector<8x64xf32>
      %cst_15 = arith.constant dense<0.000000e+00> : vector<8xf32>
      %19 = vector.multi_reduction <add>, %18, %cst_15 [1] : vector<8x64xf32> to vector<8xf32>
      %20 = vector.shape_cast %19 : vector<8xf32> to vector<8x1xf32>
      %cst_16 = arith.constant 6.400000e+01 : f32
      %21 = vector.broadcast %cst_16 : f32 to vector<8x1xf32>
      %22 = arith.divf %20, %21 : vector<8x1xf32>
      %23 = vector.broadcast %22 : vector<8x1xf32> to vector<8x64xf32>
      %24 = arith.subf %18, %23 : vector<8x64xf32>
      %25 = arith.mulf %24, %24 : vector<8x64xf32>
      %cst_17 = arith.constant dense<0.000000e+00> : vector<8xf32>
      %26 = vector.multi_reduction <add>, %25, %cst_17 [1] : vector<8x64xf32> to vector<8xf32>
      %27 = vector.shape_cast %26 : vector<8xf32> to vector<8x1xf32>
      %cst_18 = arith.constant 6.400000e+01 : f32
      %28 = vector.broadcast %cst_18 : f32 to vector<8x1xf32>
      %29 = arith.divf %27, %28 : vector<8x1xf32>
      %cst_19 = arith.constant 9.99999974E-6 : f32
      %30 = vector.broadcast %cst_19 : f32 to vector<8x1xf32>
      %31 = arith.addf %29, %30 : vector<8x1xf32>
      %32 = math.rsqrt %31 : vector<8x1xf32>
      %33 = vector.broadcast %32 : vector<8x1xf32> to vector<8x64xf32>
      %34 = arith.mulf %24, %33 : vector<8x64xf32>
      %c0_20 = arith.constant 0 : index
      %c0_21 = arith.constant 0 : index
      %35 = vector.load %arg3[%c0_20, %c0_21] : memref<1x64xf32, #tpu.memory_space<vmem>>, vector<1x64xf32>
      %36 = vector.shape_cast %35 : vector<1x64xf32> to vector<64xf32>
      %37 = vector.shape_cast %36 : vector<64xf32> to vector<1x64xf32>
      %38 = vector.broadcast %37 : vector<1x64xf32> to vector<8x64xf32>
      %39 = arith.mulf %34, %38 : vector<8x64xf32>
      %c0_22 = arith.constant 0 : index
      %c0_23 = arith.constant 0 : index
      %40 = vector.load %arg4[%c0_22, %c0_23] : memref<1x64xf32, #tpu.memory_space<vmem>>, vector<1x64xf32>
      %41 = vector.shape_cast %40 : vector<1x64xf32> to vector<64xf32>
      %42 = vector.shape_cast %41 : vector<64xf32> to vector<1x64xf32>
      %43 = vector.broadcast %42 : vector<1x64xf32> to vector<8x64xf32>
      %44 = arith.addf %39, %43 : vector<8x64xf32>
      %c0_24 = arith.constant 0 : index
      %c0_25 = arith.constant 0 : index
      %45 = vector.load %arg5[%c0_24, %c0_25] : memref<64x512xf32, #tpu.memory_space<vmem>>, vector<64x512xf32>
      %cst_26 = arith.constant dense<0.000000e+00> : vector<8x512xf32>
      %46 = tpu.matmul %44, %45, %cst_26 {dimension_numbers = #tpu.dot_dimension_numbers<[1], [0], [0], [1], [0, 0, 1, 1], [], []>} : vector<8x64xf32>, vector<64x512xf32>, vector<8x512xf32> -> vector<8x512xf32>
      %c0_27 = arith.constant 0 : index
      %c0_28 = arith.constant 0 : index
      %47 = vector.load %arg6[%c0_27, %c0_28] : memref<1x512xf32, #tpu.memory_space<vmem>>, vector<1x512xf32>
      %48 = vector.shape_cast %47 : vector<1x512xf32> to vector<512xf32>
      %49 = vector.shape_cast %48 : vector<512xf32> to vector<1x512xf32>
      %50 = vector.broadcast %49 : vector<1x512xf32> to vector<8x512xf32>
      %51 = arith.addf %46, %50 : vector<8x512xf32>
      %cst_29 = arith.constant 5.000000e-01 : f32
      %52 = vector.broadcast %cst_29 : f32 to vector<8x512xf32>
      %53 = arith.mulf %52, %51 : vector<8x512xf32>
      %cst_30 = arith.constant 0.707106769 : f32
      %54 = vector.broadcast %cst_30 : f32 to vector<8x512xf32>
      %55 = arith.mulf %51, %54 : vector<8x512xf32>
      %56 = math.erf %55 : vector<8x512xf32>
      %cst_31 = arith.constant 1.000000e+00 : f32
      %57 = vector.broadcast %cst_31 : f32 to vector<8x512xf32>
      %58 = arith.addf %57, %56 : vector<8x512xf32>
      %59 = arith.mulf %53, %58 : vector<8x512xf32>
      %c0_32 = arith.constant 0 : index
      %c0_33 = arith.constant 0 : index
      %60 = vector.load %arg9[%c0_32, %c0_33] : memref<2x8xf32, #tpu.memory_space<vmem>>, vector<2x8xf32>
      %cst_34 = arith.constant dense<0.000000e+00> : vector<2x512xf32>
      %61 = tpu.matmul %60, %59, %cst_34 {dimension_numbers = #tpu.dot_dimension_numbers<[1], [0], [0], [1], [0, 0, 1, 1], [], []>} : vector<2x8xf32>, vector<8x512xf32>, vector<2x512xf32> -> vector<2x512xf32>
      %c0_35 = arith.constant 0 : index
      %c0_36 = arith.constant 0 : index
      %62 = vector.load %arg7[%c0_35, %c0_36] : memref<512x128xf32, #tpu.memory_space<vmem>>, vector<512x128xf32>
      %cst_37 = arith.constant dense<0.000000e+00> : vector<2x128xf32>
      %63 = tpu.matmul %61, %62, %cst_37 {dimension_numbers = #tpu.dot_dimension_numbers<[1], [0], [0], [1], [0, 0, 1, 1], [], []>} : vector<2x512xf32>, vector<512x128xf32>, vector<2x128xf32> -> vector<2x128xf32>
      %c0_38 = arith.constant 0 : index
      %c0_39 = arith.constant 0 : index
      %64 = vector.load %arg8[%c0_38, %c0_39] : memref<1x128xf32, #tpu.memory_space<vmem>>, vector<1x128xf32>
      %65 = vector.shape_cast %64 : vector<1x128xf32> to vector<128xf32>
      %66 = vector.shape_cast %65 : vector<128xf32> to vector<1x128xf32>
      %67 = vector.broadcast %66 : vector<1x128xf32> to vector<2x128xf32>
      %68 = arith.addf %63, %67 : vector<2x128xf32>
      %c0_40 = arith.constant 0 : index
      %c0_41 = arith.constant 0 : index
      %c0_42 = arith.constant 0 : index
      %69 = vector.load %arg10[%c0_40, %c0_41, %c0_42] : memref<1x2x128xf32, #tpu.memory_space<vmem>>, vector<1x2x128xf32>
      %70 = vector.shape_cast %69 : vector<1x2x128xf32> to vector<2x128xf32>
      %71 = vector.shape_cast %68 : vector<2x128xf32> to vector<1x2x128xf32>
      tpu.vector_store %arg10[%c0_40, %c0_41, %c0_42], %71 {strides = array<i32>} : memref<1x2x128xf32, #tpu.memory_space<vmem>>, vector<1x2x128xf32>,
    } else {
    }
    return
  }
  func.func @transform_0(%arg0: i32, %arg1: i32) -> (i32, i32, i32, i32) {
    %c0_i32 = arith.constant 0 : i32
    %c0_i32_0 = arith.constant 0 : i32
    %c0_i32_1 = arith.constant 0 : i32
    return %arg0, %c0_i32, %arg1, %c0_i32_0 : i32, i32, i32, i32
  }
  func.func @transform_1(%arg0: i32, %arg1: i32) -> (i32, i32) {
    %c0_i32 = arith.constant 0 : i32
    %c0_i32_0 = arith.constant 0 : i32
    %c0_i32_1 = arith.constant 0 : i32
    return %c0_i32, %c0_i32_0 : i32, i32
  }
  func.func @transform_2(%arg0: i32, %arg1: i32) -> (i32, i32) {
    %c0_i32 = arith.constant 0 : i32
    %c0_i32_0 = arith.constant 0 : i32
    %c0_i32_1 = arith.constant 0 : i32
    return %c0_i32, %c0_i32_0 : i32, i32
  }
  func.func @transform_3(%arg0: i32, %arg1: i32) -> (i32, i32) {
    %c0_i32 = arith.constant 0 : i32
    %c0_i32_0 = arith.constant 0 : i32
    %c0_i32_1 = arith.constant 0 : i32
    return %c0_i32, %c0_i32_0 : i32, i32
  }
  func.func @transform_4(%arg0: i32, %arg1: i32) -> (i32, i32) {
    %c0_i32 = arith.constant 0 : i32
    %c0_i32_0 = arith.constant 0 : i32
    %c0_i32_1 = arith.constant 0 : i32
    return %c0_i32, %c0_i32_0 : i32, i32
  }
  func.func @transform_5(%arg0: i32, %arg1: i32) -> (i32, i32) {
    %c0_i32 = arith.constant 0 : i32
    %c0_i32_0 = arith.constant 0 : i32
    %c0_i32_1 = arith.constant 0 : i32
    return %c0_i32, %c0_i32_0 : i32, i32
  }
  func.func @transform_6(%arg0: i32, %arg1: i32) -> (i32, i32) {
    %c0_i32 = arith.constant 0 : i32
    %c0_i32_0 = arith.constant 0 : i32
    %c0_i32_1 = arith.constant 0 : i32
    return %c0_i32, %c0_i32_0 : i32, i32
  }
  func.func @transform_7(%arg0: i32, %arg1: i32) -> (i32, i32) {
    %c0_i32 = arith.constant 0 : i32
    %c0_i32_0 = arith.constant 0 : i32
    %c0_i32_1 = arith.constant 0 : i32
    return %c0_i32, %c0_i32_0 : i32, i32
  }
  func.func @transform_8(%arg0: i32, %arg1: i32) -> (i32, i32, i32) {
    %c0_i32 = arith.constant 0 : i32
    %c0_i32_0 = arith.constant 0 : i32
    %c0_i32_1 = arith.constant 0 : i32
    return %arg0, %c0_i32, %c0_i32_0 : i32, i32, i32
  }
}

</mosaic_0001>

<bundles_post_ra>
// kernel: tpu_custom_call.1
= control target key start
LH: loop header
LB: loop body
LE: loop exit
PB: predicated region body
PF: predicated region fallthrough
CT: control target
= control target key end

     0   :  { %13 = vsyncpa [#allocation5], 0  ;;  %s2477_s0 = inlined_call_operand.vmem [shape: bf16[4,4,192,64], index: 0, kind: input, shape index: {}]   ;;  %s2478_s1 = inlined_call_operand.vmem [shape: f32[1,64], index: 1, kind: input, shape index: {}]   ;;  %s2479_s2 = inlined_call_operand.vmem [shape: f32[1,64], index: 2, kind: input, shape index: {}]   ;;  %s2480_s3 = inlined_call_operand.vmem [shape: f32[64,512], index: 3, kind: input, shape index: {}]   ;;  %s2481_s4 = inlined_call_operand.vmem [shape: f32[1,512], index: 4, kind: input, shape index: {}]   ;;  %s2482_s5 = inlined_call_operand.vmem [shape: f32[512,128], index: 5, kind: input, shape index: {}]   ;;  %s2483_s6 = inlined_call_operand.vmem [shape: f32[1,128], index: 6, kind: input, shape index: {}]   ;;  %s2484_s7 = inlined_call_operand.vmem [shape: f32[2,8], index: 7, kind: input, shape index: {}]   ;;  %s2485_s8 = inlined_call_operand.hbm [shape: f32[2,2,128], index: 8, kind: output, shape index: {}]  }
   0x1   :  { %15 = vsyncpa [#allocation5 + $0x1], 0  ;;  %s1904_s27 = smov 0   ;;  %s1906_s28 = smov 0  }
   0x2   :  { %s1908_s29 = smov 0   ;;  %s1910_s30 = smov 0  }
   0x3   :  { %s1912_s9 = smov 0   ;;  %s1914_s10 = smov 0  }
   0x4   :  { %s1916_s11 = smov 0   ;;  %s1918_s12 = smov 0  }
   0x5   :  { %s1920_s13 = smov 0   ;;  %s1922_s14 = smov 0  }
   0x6 LB: > { %2491 = sst [smem:[#allocation7_spill]] %s1818_s27  ;;  %s1414_s15 = sadd.s32 4294967295, %s1854_s14   ;;  %s1854_s14 = sphi %s1922_s14, %s21_s14   ;;  %s1850_s13 = sphi %s1920_s13, %s2513_s13   ;;  %s1846_s12 = sphi %s1918_s12, %s2512_s12   ;;  %s1842_s11 = sphi %s1916_s11, %s2511_s11   ;;  %s1838_s10 = sphi %s1914_s10, %s2510_s10   ;;  %s1834_s9 = sphi %s1912_s9, %s2509_s9   ;;  %s1830_s30 = sphi %s1910_s30, %s2508_s30   ;;  %s1826_s29 = sphi %s1908_s29, %s2507_s29   ;;  %s1822_s28 = sphi %s1906_s28, %s2506_s28   ;;  %s1818_s27 = sphi %s1904_s27, %s2505_s27  }
   0x7   : > { %s1415_s16 = sadd.s32 4294967294, %s1854_s14   ;;  %s30_s17 = sadd.s32 1, %s1846_s12 }
   0x8   : > { %s33_s18 = sadd.s32 1, %s1850_s13  ;;  %p31_p0 = scmp.ge.s32.totalorder %s30_s17, 12 }
   0x9   : > { %s42_s19 = sadd.s32 1, %s1834_s9  ;;  %p49_p1 = scmp.ne.s32.totalorder %s1834_s9, %s1830_s30 }
   0xa   : > { %p50_p2 = scmp.eq.s32.totalorder %s1854_s14, 0  ;;  %s2515_s17 = smov (%p31_p0, %s30_s17), 0 }
   0xb   : > { %2492 = sst [smem:[#allocation8_spill]] %s2515_s17  ;;  %s2517_s18 = smov (!%p31_p0, %s33_s18), %s1850_s13 }
   0xc   : > { %s38_s20 = ssub.s32 %s1846_s12, %s2515_s17  ;;  %p1967_p3 = por %p50_p2, %p49_p1 }
   0xd   : > { %p35_p4 = scmp.ge.s32.totalorder %s2517_s18, 2  ;;  %s215_s22 = sadd.s32 1, %s1826_s29 }
   0xe   : > { %p225_p5 = scmp.ne.s32.totalorder %s1826_s29, %s1822_s28  ;;  %p226_p6 = scmp.eq.s32.totalorder %s1414_s15, 23 }
   0xf   : > { %s2519_s18 = smov (%p35_p4, %s2517_s18), 0  ;;  %p231_p8 = scmp.ne.s32.totalorder %s1822_s28, %s1818_s27 }
  0x10   : > { %2494 = sst [smem:[#allocation9_spill]] %s2519_s18  ;;  %p1976_p7 = por %p226_p6, %p225_p5 }
  0x11   : > { %s37_s24 = ssub.s32 %s1850_s13, %s2519_s18  ;;  %p232_p9 = scmp.eq.s32.totalorder %s1415_s16, 23 }
  0x12   : > { %s39_s25 = sor.u32 %s38_s20, %s37_s24  ;;  %p213_p10 = scmp.eq.s32.totalorder %s37_s24, 0 }
  0x13   : > { %p40_p11 = scmp.eq.s32.totalorder %s39_s25, 0  ;;  %p1984_p12 = por %p232_p9, %p231_p8 }
  0x14   : > { %s1989_s17 = scalar_select %p213_p10, %s1826_s29, %s215_s22  }
  0x15   : > { %s2496_s26 = scalar_select %p1984_p12, 1, 0 }
  0x16   : > { %s1992_s15 = scalar_select %p40_p11, %s1834_s9, %s42_s19  }
  0x17   : > { %2497 = sst [smem:[#allocation10_spill]] %s2496_s26  ;;  %p1417_p13 = scmp.ge.s32.totalorder %s1854_s14, 24 }
  0x18   : > { %2498 = sst [smem:[#allocation11_spill]] %s1992_s15 }
  0x19   : > { %269 = sbr.rel (%p1417_p13) target bundleno = 48 (0x30), region = 44 }
  0x20   : > { %272 = sbr.rel (!%p1967_p3) target bundleno = 48 (0x30), region = 48  ;;  %s274_s16 = sand.u32 (%p1967_p3), 1, %s1834_s9  }
  0x21   : > { %s1420_s20 = sshll.u32 (%p1967_p3), %s1846_s12, 1  ;;  %s1418_s24 = sshll.u32 (%p1967_p3), %s274_s16, 6 }
  0x22   : > { %s1644_s25 = smul.u32 (%p1967_p3), 192, %s1850_s13  ;;  %s276_s15 = scalar_lea.vmem (%p1967_p3), [#allocation3], %s1418_s24 }
  0x24   : > { %s280_s18 = sadd.s32 (%p1967_p3), %s1644_s25, %s1420_s20 }
  0x25   : > { %s1422_s27 = sshll.u32 (%p1967_p3), %s280_s18, 2 }
  0x26   : > { %s282_s19 = scalar_lea.vmem (%p1967_p3), %s2477_s0, %s1422_s27 }
  0x27   : > { %v298_v0 = vld [vmem:[%s282_s19] sm:$0xff]  }
  0x28   : > { %v302_v1 = vld [vmem:[%s282_s19 + $0x60] sm:$0xff]   ;;  %299 = vst [vmem:[%s276_s15] sm:$0xff] %v298_v0  }
  0x29   : > { %v306_v2 = vld [vmem:[%s282_s19 + $0xc0] sm:$0xff]   ;;  %303 = vst [vmem:[%s276_s15 + $0x8] sm:$0xff] %v302_v1  }
  0x2a   : > { %307 = vst [vmem:[%s276_s15 + $0x10] sm:$0xff] %v306_v2   ;;  %v310_v3 = vld [vmem:[%s282_s19 + $0x120] sm:$0xff]  }
  0x2b   : > { %v314_v4 = vld [vmem:[%s282_s19 + $0x180] sm:$0xff]   ;;  %311 = vst [vmem:[%s276_s15 + $0x18] sm:$0xff] %v310_v3  }
  0x2c   : > { %v318_v5 = vld [vmem:[%s282_s19 + $0x1e0] sm:$0xff]   ;;  %315 = vst [vmem:[%s276_s15 + $0x20] sm:$0xff] %v314_v4  }
  0x2d   : > { %319 = vst [vmem:[%s276_s15 + $0x28] sm:$0xff] %v318_v5   ;;  %v322_v6 = vld [vmem:[%s282_s19 + $0x240] sm:$0xff]  }
  0x2e   : > { %v326_v7 = vld [vmem:[%s282_s19 + $0x2a0] sm:$0xff]   ;;  %323 = vst [vmem:[%s276_s15 + $0x30] sm:$0xff] %v322_v6  }
  0x2f   : > { %327 = vst [vmem:[%s276_s15 + $0x38] sm:$0xff] %v326_v7  }
  0x30 PF: > { %p1423_p0 = scmp.ge.s32.totalorder %s1854_s14, 1  ;;  %p383_p1 = scmp.lt.s32.totalorder %s1854_s14, 25 }
  0x32   : > { %p384_p2 = pnand %p1423_p0, %p383_p1 }
  0x33   : > { %s390_s27 = sand.u32 (!%p384_p2), 1, %s1830_s30   ;;  %s2490_s18 = sand.u32 (!%p384_p2), 1, %s1822_s28  }
  0x34   : > { %387 = sbr.rel (%p384_p2) target bundleno = 1132 (0x46c), region = 89  ;;  %s1424_s21 = sshll.u32 (!%p384_p2), %s390_s27, 6 }
  0x35   : > { %s2009_s26 = sshll.u32 (!%p384_p2), %s2490_s18, 1  ;;  %s2011_s16 = scalar_lea.vmem (!%p384_p2), [#allocation3], %s1424_s21 }
  0x36   : > { %s422_s15 = scalar_lea.vmem (!%p384_p2), [#allocation4], %s2009_s26  ;;  %p1426_p3 = scmp.ne.s32.totalorder (!%p384_p2), %s1838_s10, 0 }
  0x3b   : > { %428 = sbr.rel (%p1426_p3) target bundleno = 66 (0x42), region = 97  ;;  %vm429_vm0 = vcmask (!%p1426_p3), 523264   ;;  %v1856_v8 = vmov (!%p1426_p3), 0.0  }
  0x3c   : > { %430 = vst.msk [vmem:[#allocation2] sm:$0xff] (!%p1426_p3), %vm429_vm0, %v1856_v8  ;;  %431 = vst.msk [vmem:[#allocation2 + $0x8] sm:$0xff] (!%p1426_p3), %vm429_vm0, %v1856_v8 }
  0x3d   : > { %432 = vst.msk [vmem:[#allocation2 + $0x10] sm:$0xff] (!%p1426_p3), %vm429_vm0, %v1856_v8  ;;  %433 = vst.msk [vmem:[#allocation2 + $0x18] sm:$0xff] (!%p1426_p3), %vm429_vm0, %v1856_v8 }
  0x3e   : > { %434 = vst.msk [vmem:[#allocation2 + $0x20] sm:$0xff] (!%p1426_p3), %vm429_vm0, %v1856_v8  ;;  %435 = vst.msk [vmem:[#allocation2 + $0x28] sm:$0xff] (!%p1426_p3), %vm429_vm0, %v1856_v8 }
  0x3f   : > { %436 = vst.msk [vmem:[#allocation2 + $0x30] sm:$0xff] (!%p1426_p3), %vm429_vm0, %v1856_v8  ;;  %437 = vst.msk [vmem:[#allocation2 + $0x38] sm:$0xff] (!%p1426_p3), %vm429_vm0, %v1856_v8 }
  0x42 PF: > { %v1440_v9 = vld [vmem:[%s2011_s16] sm:$0xff]   ;;  %v1471_v10 = vld [vmem:[%s2011_s16 + $0x8] sm:$0xff]   ;;  %v1472_v16 = vld [vmem:[%s2011_s16 + $0x10] sm:$0xff]   ;;  %vm494_vm1 = vcmask 523264   ;;  %p1427_p4 = scmp.ne.s32.totalorder %s1838_s10, 11 }
  0x43   : > { %v1441_v11 = vunpack.c.l.bf16 %v1440_v9  ;;  %v1442_v12 = vunpack.c.h.bf16 %v1440_v9  ;;  %v470_v13 = vld [vmem:[#allocation2] sm:$0xff]  ;;  %v1445_v14 = vunpack.c.l.bf16 %v1471_v10  ;;  %v1446_v15 = vunpack.c.h.bf16 %v1471_v10  ;;  %v471_v17 = vld [vmem:[#allocation2 + $0x8] sm:$0xff]  ;;  %v1473_v20 = vld [vmem:[%s2011_s16 + $0x18] sm:$0xff]  }
  0x44   : > { %v1449_v18 = vunpack.c.l.bf16 %v1472_v16  ;;  %v1450_v19 = vunpack.c.h.bf16 %v1472_v16  ;;  %v1474_v21 = vld [vmem:[%s2011_s16 + $0x20] sm:$0xff]   ;;  %v472_v24 = vld [vmem:[#allocation2 + $0x10] sm:$0xff]  ;;  %v1453_v25 = vunpack.c.l.bf16 %v1473_v20  ;;  %v1454_v26 = vunpack.c.h.bf16 %v1473_v20  ;;  %v1475_v27 = vld [vmem:[%s2011_s16 + $0x28] sm:$0xff]  }
  0x45   : > { %v478_v22 = vadd.f32 %v1442_v12, %v1441_v11  ;;  %v479_v23 = vadd.f32 %v1446_v15, %v1445_v14  ;;  %v473_v29 = vld [vmem:[#allocation2 + $0x18] sm:$0xff]  ;;  %v1457_v30 = vunpack.c.l.bf16 %v1474_v21  ;;  %v1458_v31 = vunpack.c.h.bf16 %v1474_v21  ;;  %v1476_v33 = vld [vmem:[%s2011_s16 + $0x30] sm:$0xff]   ;;  %v474_v38 = vld [vmem:[#allocation2 + $0x20] sm:$0xff] }
  0x46   : > { %v480_v28 = vadd.f32 %v1450_v19, %v1449_v18  ;;  %v1461_v32 = vunpack.c.l.bf16 %v1475_v27  ;;  %v1477_v34 = vld [vmem:[%s2011_s16 + $0x38] sm:$0xff]   ;;  %v481_v37 = vadd.f32 %v1454_v26, %v1453_v25  ;;  %v1462_v39 = vunpack.c.h.bf16 %v1475_v27  ;;  %v475_v42 = vld [vmem:[#allocation2 + $0x28] sm:$0xff]  ;;  %v476_v47 = vld [vmem:[#allocation2 + $0x30] sm:$0xff] }
  0x47   : > { %v486_v35 = vadd.f32 %v478_v22, %v470_v13  ;;  %v487_v36 = vadd.f32 %v479_v23, %v471_v17  ;;  %v482_v41 = vadd.f32 %v1458_v31, %v1457_v30  ;;  %v1465_v43 = vunpack.c.l.bf16 %v1476_v33  ;;  %v477_v52 = vld [vmem:[#allocation2 + $0x38] sm:$0xff] }
  0x48   : > { %v488_v40 = vadd.f32 %v480_v28, %v472_v24  ;;  %v1466_v44 = vunpack.c.h.bf16 %v1476_v33  ;;  %v489_v45 = vadd.f32 %v481_v37, %v473_v29  ;;  %v483_v46 = vadd.f32 %v1462_v39, %v1461_v32 }
  0x49   : > { %495 = vst.msk [vmem:[#allocation2] sm:$0xff] %vm494_vm1, %v486_v35  ;;  %496 = vst.msk [vmem:[#allocation2 + $0x8] sm:$0xff] %vm494_vm1, %v487_v36  ;;  %v1469_v48 = vunpack.c.l.bf16 %v1477_v34  ;;  %v1470_v49 = vunpack.c.h.bf16 %v1477_v34  ;;  %v490_v50 = vadd.f32 %v482_v41, %v474_v38  ;;  %506 = sbr.rel (%p1427_p4) target bundleno = 1107 (0x453), region = 101  ;;  %vm587_vm2 = vcmask (!%p1427_p4), 1041409  }
  0x4a   : > { %497 = vst.msk [vmem:[#allocation2 + $0x10] sm:$0xff] %vm494_vm1, %v488_v40  ;;  %v484_v51 = vadd.f32 %v1466_v44, %v1465_v43  ;;  %498 = vst.msk [vmem:[#allocation2 + $0x18] sm:$0xff] %vm494_vm1, %v489_v45  ;;  %v491_v53 = vadd.f32 %v483_v46, %v475_v42  ;;  %vm589_vm3 = vcmask (!%p1427_p4), 1042434   ;;  %vm591_vm4 = vcmask (!%p1427_p4), 1043459  }
  0x4b   : > { %v485_v54 = vadd.f32 %v1470_v49, %v1469_v48  ;;  %499 = vst.msk [vmem:[#allocation2 + $0x20] sm:$0xff] %vm494_vm1, %v490_v50  ;;  %vm593_vm5 = vcmask (!%p1427_p4), 1044484   ;;  %vm595_vm6 = vcmask (!%p1427_p4), 1045509   ;;  %vm597_vm7 = vcmask (!%p1427_p4), 1046534  }
  0x4c   : > { %v492_v55 = vadd.f32 %v484_v51, %v476_v47  ;;  %500 = vst.msk [vmem:[#allocation2 + $0x28] sm:$0xff] %vm494_vm1, %v491_v53  ;;  %vm599_vm8 = vcmask (!%p1427_p4), 1047559   ;;  %vm963_vm9 = vcmask (!%p1427_p4), 64512  }
  0x4d   : > { %v493_v56 = vadd.f32 %v485_v54, %v477_v52 }
  0x4e   : > { %501 = vst.msk [vmem:[#allocation2 + $0x30] sm:$0xff] %vm494_vm1, %v492_v55 }
  0x4f   : > { %502 = vst.msk [vmem:[#allocation2 + $0x38] sm:$0xff] %vm494_vm1, %v493_v56 }
  0x50   : > { %v507_v57 = vld [vmem:[#allocation2] sm:$0xff]  ;;  %v508_v58 = vld [vmem:[#allocation2 + $0x8] sm:$0xff] }
  0x51   : > { %v509_v59 = vld [vmem:[#allocation2 + $0x10] sm:$0xff]  ;;  %v510_v60 = vld [vmem:[#allocation2 + $0x18] sm:$0xff]  ;;  %v515_v63 = vsel %vm494_vm1, %v507_v57, 0.0  ;;  %v522_v0 = vsel %vm494_vm1, %v508_v58, 0.0 }
  0x52   : > { %v511_v61 = vld [vmem:[#allocation2 + $0x20] sm:$0xff]  ;;  %v529_v1 = vsel %vm494_vm1, %v509_v59, 0.0  ;;  %v516_v4 = vrot.slane %v515_v63, 4  ;;  %v523_v5 = vrot.slane %v522_v0, 4  ;;  %v536_v7 = vsel %vm494_vm1, %v510_v60, 0.0 }
  0x53   : > { %v512_v62 = vld [vmem:[#allocation2 + $0x28] sm:$0xff]  ;;  %v530_v6 = vrot.slane %v529_v1, 4  ;;  %v537_v8 = vrot.slane %v536_v7, 4  ;;  %v543_v9 = vsel %vm494_vm1, %v511_v61, 0.0 }
  0x54   : > { %v550_v10 = vsel %vm494_vm1, %v512_v62, 0.0  ;;  %v517_v12 = vadd.f32 %v516_v4, %v515_v63  ;;  %v524_v13 = vadd.f32 %v523_v5, %v522_v0  ;;  %v544_v15 = vrot.slane %v543_v9, 4 }
  0x55   : > { %v513_v2 = vld [vmem:[#allocation2 + $0x30] sm:$0xff]  ;;  %v531_v14 = vadd.f32 %v530_v6, %v529_v1  ;;  %v538_v16 = vadd.f32 %v537_v8, %v536_v7  ;;  %v551_v17 = vrot.slane %v550_v10, 4 }
  0x56   : > { %v514_v3 = vld [vmem:[#allocation2 + $0x38] sm:$0xff]  ;;  %v557_v11 = vsel %vm494_vm1, %v513_v2, 0.0  ;;  %v518_v20 = vrot.slane %v517_v12, 2  ;;  %v525_v21 = vrot.slane %v524_v13, 2  ;;  %v545_v23 = vadd.f32 %v544_v15, %v543_v9 }
  0x57   : > { %v558_v18 = vrot.slane %v557_v11, 4  ;;  %v564_v19 = vsel %vm494_vm1, %v514_v3, 0.0  ;;  %v532_v22 = vrot.slane %v531_v14, 2  ;;  %v539_v24 = vrot.slane %v538_v16, 2 }
  0x58   : > { %v552_v25 = vadd.f32 %v551_v17, %v550_v10  ;;  %v565_v27 = vrot.slane %v564_v19, 4  ;;  %v519_v28 = vadd.f32 %v518_v20, %v517_v12  ;;  %v526_v29 = vadd.f32 %v525_v21, %v524_v13 }
  0x59   : > { %v559_v26 = vadd.f32 %v558_v18, %v557_v11  ;;  %v533_v30 = vadd.f32 %v532_v22, %v531_v14  ;;  %v546_v31 = vrot.slane %v545_v23, 2  ;;  %v540_v32 = vadd.f32 %v539_v24, %v538_v16 }
  0x5a   : > { %v553_v33 = vrot.slane %v552_v25, 2  ;;  %v566_v35 = vadd.f32 %v565_v27, %v564_v19  ;;  %v520_v36 = vrot.slane %v519_v28, 1  ;;  %v527_v37 = vrot.slane %v526_v29, 1 }
  0x5b   : > { %v560_v34 = vrot.slane %v559_v26, 2  ;;  %v534_v38 = vrot.slane %v533_v30, 1  ;;  %v547_v39 = vadd.f32 %v546_v31, %v545_v23  ;;  %v541_v40 = vrot.slane %v540_v32, 1 }
  0x5c   : > { %v554_v41 = vadd.f32 %v553_v33, %v552_v25  ;;  %v567_v43 = vrot.slane %v566_v35, 2  ;;  %v521_v44 = vadd.f32 %v520_v36, %v519_v28  ;;  %v528_v45 = vadd.f32 %v527_v37, %v526_v29 }
  0x5d   : > { %v561_v42 = vadd.f32 %v560_v34, %v559_v26  ;;  %v535_v46 = vadd.f32 %v534_v38, %v533_v30  ;;  %v548_v47 = vrot.slane %v547_v39, 1  ;;  %v542_v48 = vadd.f32 %v541_v40, %v540_v32 }
  0x5e   : > { %v555_v49 = vrot.slane %v554_v41, 1  ;;  %v568_v51 = vadd.f32 %v567_v43, %v566_v35  ;;  %v571_v53 = vmul.f32 0.0052083335, %v521_v44  ;;  %v572_v54 = vmul.f32 0.0052083335, %v528_v45 }
  0x5f   : > { %v562_v50 = vrot.slane %v561_v42, 1  ;;  %v549_v52 = vadd.f32 %v548_v47, %v547_v39  ;;  %v573_v55 = vmul.f32 0.0052083335, %v535_v46  ;;  %v574_v59 = vmul.f32 0.0052083335, %v542_v48 }
  0x60   : > { %v556_v56 = vadd.f32 %v555_v49, %v554_v41  ;;  %v569_v58 = vrot.slane %v568_v51, 1  ;;  %v588_v61 = vsel %vm587_vm2, %v572_v54, %v571_v53  ;;  %v723_v49 = vld [vmem:[%s2480_s3 + $0x8] sm:$0xff] }
  0x61   : > { %v563_v57 = vadd.f32 %v562_v50, %v561_v42  ;;  %v575_v60 = vmul.f32 0.0052083335, %v549_v52  ;;  %v590_v1 = vsel %vm589_vm3, %v573_v55, %v588_v61  ;;  %v727_v50 = vld [vmem:[%s2480_s3 + $0x28] sm:$0xff] }
  0x62   : > { %v570_v62 = vadd.f32 %v569_v58, %v568_v51  ;;  %v576_v63 = vmul.f32 0.0052083335, %v556_v56  ;;  %v592_v2 = vsel %vm591_vm4, %v574_v59, %v590_v1  ;;  %v725_v51 = vld [vmem:[%s2480_s3 + $0x18] sm:$0xff]  ;;  %v1548_v52 = vpack.c.bf16 %v727_v50, %v723_v49  ;;  %v731_v61 = vld [vmem:[%s2480_s3 + $0x48] sm:$0xff]  ;;  %v1428_v50 = vld [vmem:[%s2478_s1] ss:$0 sm:$0xff] }
  0x63   : > { %v577_v0 = vmul.f32 0.0052083335, %v563_v57  ;;  %v594_v4 = vsel %vm593_vm5, %v575_v60, %v592_v2  ;;  %v1857_v56 = vmov 0.0   ;;  %v737_v1 = vld [vmem:[%s2480_s3 + $0x78] sm:$0xff] }
  0x64   : > { %v578_v3 = vmul.f32 0.0052083335, %v570_v62  ;;  %v596_v5 = vsel %vm595_vm6, %v576_v63, %v594_v4  ;;  %864 = vmatprep.mubr.f32.mxu0 %v1857_v56  ;;  %935 = vmatprep.mubr.f32.mxu1 %v1857_v56  ;;  %v730_v4 = vld [vmem:[%s2480_s3 + $0x40] sm:$0xff] }
  0x65   : > { %v598_v6 = vsel %vm597_vm7, %v577_v0, %v596_v5  ;;  %1549 = vmatprep.subr.bf16.mxu0 %v1548_v52  ;;  %v734_v5 = vld [vmem:[%s2480_s3 + $0x60] sm:$0xff] }
  0x66   : > { %v600_v7 = vsel %vm599_vm8, %v578_v3, %v598_v6  ;;  %v732_v6 = vld [vmem:[%s2480_s3 + $0x50] sm:$0xff] }
  0x67   : > { %v602_v8 = vsel %vm494_vm1, %v600_v7, 0.0  ;;  %v1554_v7 = vpack.c.bf16 %v734_v5, %v730_v4 }
  0x68   : > { %603 = vadd.xlane.f32.xlu0 %v602_v8  ;;  %v736_v8 = vld [vmem:[%s2480_s3 + $0x70] sm:$0xff] }
  0xf5   : > { %v604_v9 = vpop.xlane.xlu0 %603 }
  0xf6   : > { %v606_v10 = vmul.f32 0.015625, %v604_v9  ;;  %v739_v9 = vld [vmem:[%s2480_s3 + $0x88] sm:$0xff] }
  0xf8   : > { %v608_v11 = vrot.slane %v606_v10, 1  ;;  %v609_v12 = vrot.slane %v606_v10, 2  ;;  %v610_v13 = vrot.slane %v606_v10, 3  ;;  %v611_v14 = vrot.slane %v606_v10, 4 }
  0xf9   : > { %v612_v15 = vrot.slane %v606_v10, 5  ;;  %v613_v16 = vrot.slane %v606_v10, 6  ;;  %v614_v17 = vrot.slane %v606_v10, 7  ;;  %v2048_v18 = vsub.f32 %v571_v53, %v606_v10  ;;  %v729_v53 = vld [vmem:[%s2480_s3 + $0x38] sm:$0xff]  ;;  %v743_v10 = vld [vmem:[%s2480_s3 + $0xa8] sm:$0xff] }
  0xfa   : > { %v2050_v19 = vsub.f32 %v572_v54, %v608_v11  ;;  %v2052_v20 = vsub.f32 %v573_v55, %v609_v12  ;;  %v2054_v21 = vsub.f32 %v574_v59, %v610_v13  ;;  %v2056_v22 = vsub.f32 %v575_v60, %v611_v14  ;;  %v722_v54 = vld [vmem:[%s2480_s3] sm:$0xff]  ;;  %v724_v59 = vld [vmem:[%s2480_s3 + $0x10] sm:$0xff]  ;;  %v741_v13 = vld [vmem:[%s2480_s3 + $0x98] sm:$0xff] }
  0xfb   : > { %v2058_v23 = vsub.f32 %v576_v63, %v612_v15  ;;  %v2060_v24 = vsub.f32 %v577_v0, %v613_v16  ;;  %v2062_v25 = vsub.f32 %v578_v3, %v614_v17  ;;  %v631_v30 = vmul.f32 %v2048_v18, %v2048_v18  ;;  %v726_v55 = vld [vmem:[%s2480_s3 + $0x20] sm:$0xff]  ;;  %v728_v60 = vld [vmem:[%s2480_s3 + $0x30] sm:$0xff]  ;;  %v735_v63 = vld [vmem:[%s2480_s3 + $0x68] sm:$0xff] }
  0xfc   : > { %v632_v26 = vmul.f32 %v2050_v19, %v2050_v19  ;;  %v633_v27 = vmul.f32 %v2052_v20, %v2052_v20  ;;  %v634_v28 = vmul.f32 %v2054_v21, %v2054_v21  ;;  %v635_v29 = vmul.f32 %v2056_v22, %v2056_v22  ;;  %v733_v0 = vld [vmem:[%s2480_s3 + $0x58] sm:$0xff]  ;;  %v738_v15 = vld [vmem:[%s2480_s3 + $0x80] sm:$0xff] }
  0xfd   : > { %v636_v31 = vmul.f32 %v2058_v23, %v2058_v23  ;;  %v637_v34 = vmul.f32 %v2060_v24, %v2060_v24  ;;  %v638_v35 = vmul.f32 %v2062_v25, %v2062_v25  ;;  %v1564_v57 = vpack.c.bf16 %v729_v53, %v725_v51  ;;  %v745_v14 = vld [vmem:[%s2480_s3 + $0xb8] sm:$0xff]  ;;  %v742_v17 = vld [vmem:[%s2480_s3 + $0xa0] sm:$0xff] }
  0xfe   : > { %v647_v32 = vrot.slane %v632_v26, 7  ;;  %v649_v33 = vrot.slane %v633_v27, 6  ;;  %v651_v37 = vrot.slane %v634_v28, 5  ;;  %v653_v39 = vrot.slane %v635_v29, 4  ;;  %v740_v26 = vld [vmem:[%s2480_s3 + $0x90] sm:$0xff]  ;;  %v747_v29 = vld [vmem:[%s2480_s3 + $0xc8] sm:$0xff] }
  0xff   : > { %v655_v41 = vrot.slane %v636_v31, 3  ;;  %v657_v43 = vrot.slane %v637_v34, 2  ;;  %v659_v45 = vrot.slane %v638_v35, 1  ;;  %v1550_v58 = vpack.c.bf16 %v726_v55, %v722_v54  ;;  %1565 = vmatprep.subr.bf16.mxu1 %v1564_v57  ;;  %v744_v27 = vld [vmem:[%s2480_s3 + $0xb0] sm:$0xff]  ;;  %v749_v31 = vld [vmem:[%s2480_s3 + $0xd8] sm:$0xff]  ;;  %v746_v35 = vld [vmem:[%s2480_s3 + $0xc0] sm:$0xff] }
 0x100   : > { %v648_v36 = vsel %vm587_vm2, %v647_v32, %v631_v30  ;;  %v1566_v62 = vpack.c.bf16 %v728_v60, %v724_v59  ;;  %v1552_v2 = vpack.c.bf16 %v735_v63, %v731_v61  ;;  %v1568_v3 = vpack.c.bf16 %v737_v1, %v733_v0  ;;  %v751_v30 = vld [vmem:[%s2480_s3 + $0xe8] sm:$0xff]  ;;  %v753_v34 = vld [vmem:[%s2480_s3 + $0xf8] sm:$0xff] }
 0x101   : > { %v650_v38 = vsel %vm589_vm3, %v649_v33, %v648_v36  ;;  %1551 = vmatpush1.bf16.msra.mxu0 %v1550_v58  ;;  %v1570_v11 = vpack.c.bf16 %v736_v8, %v732_v6  ;;  %v1556_v12 = vpack.c.bf16 %v743_v10, %v739_v9  ;;  %v1572_v16 = vpack.c.bf16 %v745_v14, %v741_v13  ;;  %v750_v36 = vld [vmem:[%s2480_s3 + $0xe0] sm:$0xff] }
 0x102   : > { %v652_v40 = vsel %vm591_vm4, %v651_v37, %v650_v38  ;;  %1567 = vmatpush1.bf16.msra.mxu1 %v1566_v62  ;;  %1553 = vmatprep.subr.bf16.mxu0 %v1552_v2  ;;  %v1558_v28 = vpack.c.bf16 %v742_v17, %v738_v15  ;;  %v1574_v32 = vpack.c.bf16 %v744_v27, %v740_v26  ;;  %v748_v38 = vld [vmem:[%s2480_s3 + $0xd0] sm:$0xff] }
 0x103   : > { %v654_v42 = vsel %vm593_vm5, %v653_v39, %v652_v40  ;;  %1569 = vmatprep.subr.bf16.mxu1 %v1568_v3  ;;  %v1560_v33 = vpack.c.bf16 %v751_v30, %v747_v29  ;;  %v1576_v37 = vpack.c.bf16 %v753_v34, %v749_v31  ;;  %v752_v39 = vld [vmem:[%s2480_s3 + $0xf0] sm:$0xff]  ;;  %v1562_v40 = vpack.c.bf16 %v750_v36, %v746_v35  ;;  %v754_v34 = vld [vmem:[%s2481_s4] sm:$0xf] }
 0x104   : > { %v656_v44 = vsel %vm595_vm6, %v655_v41, %v654_v42  ;;  %v1578_v41 = vpack.c.bf16 %v752_v39, %v748_v38  ;;  %v756_v30 = vlaneseq }
 0x105   : > { %v658_v46 = vsel %vm597_vm7, %v657_v43, %v656_v44  ;;  %1555 = vmatpush1.bf16.msra.mxu0 %v1554_v7 }
 0x106   : > { %v660_v47 = vsel %vm599_vm8, %v659_v45, %v658_v46  ;;  %1571 = vmatpush1.bf16.msra.mxu1 %v1570_v11  ;;  %1557 = vmatprep.subr.bf16.mxu0 %v1556_v12  ;;  %v757_v31 = vshrl.u32 %v756_v30, 7  ;;  %v1161_v30 = vld [vmem:[%s2482_s5 + $0x1a0] sm:$0xff] }
 0x107   : > { %v662_v48 = vsel %vm494_vm1, %v660_v47, 0.0  ;;  %1573 = vmatprep.subr.bf16.mxu1 %v1572_v16 }
 0x108   : > { %663 = vadd.xlane.f32.xlu0 %v662_v48  ;;  %v762_v35 = vsub.s32 1, %v757_v31  ;;  %v770_v36 = vsub.s32 3, %v757_v31 }
 0x109   : > { %1559 = vmatpush1.bf16.msra.mxu0 %v1558_v28 }
 0x10a   : > { %1575 = vmatpush1.bf16.msra.mxu1 %v1574_v32  ;;  %1561 = vmatprep.subr.bf16.mxu0 %v1560_v33  ;;  %v758_v32 = vsub.s32 0, %v757_v31  ;;  %v766_v33 = vsub.s32 2, %v757_v31  ;;  %v763_v39 = vrot.slane %v754_v34, %v762_v35  ;;  %v1162_v31 = vld [vmem:[%s2482_s5 + $0x1a8] sm:$0xff]  ;;  %v1113_v35 = vld [vmem:[%s2482_s5 + $0x20] sm:$0xff] }
 0x10b   : > { %1577 = vmatprep.subr.bf16.mxu1 %v1576_v37 }
 0x10c   : > { %v759_v37 = vrot.slane %v754_v34, %v758_v32  ;;  %v767_v38 = vrot.slane %v754_v34, %v766_v33 }
 0x10d   : > { %1563 = vmatpush1.bf16.msra.mxu0 %v1562_v40  ;;  %v771_v40 = vrot.slane %v754_v34, %v770_v36  ;;  %v1114_v36 = vld [vmem:[%s2482_s5 + $0x28] sm:$0xff] }
 0x10e   : > { %1579 = vmatpush1.bf16.msra.mxu1 %v1578_v41 }
 0x195   : > { %v664_v42 = vpop.xlane.xlu0 %663 }
 0x196   : > { %v665_v43 = vmul.f32 0.015625, %v664_v42 }
 0x198   : > { %v666_v44 = vadd.f32 1e-05, %v665_v43 }
 0x19a   : > { %1734 = vrsqrt.f32 %v666_v44 }
 0x1a4   : > { %v1735_v45 = vpop.eup %1734 }
 0x1a5   : > { %v669_v46 = vrot.slane %v1735_v45, 1  ;;  %v670_v47 = vrot.slane %v1735_v45, 2  ;;  %v671_v48 = vrot.slane %v1735_v45, 3  ;;  %v672_v49 = vrot.slane %v1735_v45, 4 }
 0x1a6   : > { %v673_v51 = vrot.slane %v1735_v45, 5  ;;  %v674_v52 = vrot.slane %v1735_v45, 6  ;;  %v675_v53 = vrot.slane %v1735_v45, 7  ;;  %v684_v54 = vmul.f32 %v1735_v45, %v2048_v18 }
 0x1a7   : > { %v685_v55 = vmul.f32 %v669_v46, %v2050_v19  ;;  %v686_v57 = vmul.f32 %v670_v47, %v2052_v20  ;;  %v687_v58 = vmul.f32 %v671_v48, %v2054_v21  ;;  %v688_v59 = vmul.f32 %v672_v49, %v2056_v22  ;;  %v1429_v19 = vld [vmem:[%s2479_s2] ss:$0 sm:$0xff] }
 0x1a8   : > { %v689_v60 = vmul.f32 %v673_v51, %v2058_v23  ;;  %v690_v61 = vmul.f32 %v674_v52, %v2060_v24  ;;  %v691_v62 = vmul.f32 %v675_v53, %v2062_v25  ;;  %v699_v63 = vmul.f32 %v1428_v50, %v684_v54 }
 0x1a9   : > { %v700_v0 = vmul.f32 %v1428_v50, %v685_v55  ;;  %v701_v1 = vmul.f32 %v1428_v50, %v686_v57  ;;  %v702_v2 = vmul.f32 %v1428_v50, %v687_v58  ;;  %v703_v3 = vmul.f32 %v1428_v50, %v688_v59  ;;  %v1125_v57 = vld [vmem:[%s2482_s5 + $0x80] sm:$0xff] }
 0x1aa   : > { %v704_v18 = vmul.f32 %v1428_v50, %v689_v60  ;;  %v705_v4 = vmul.f32 %v1428_v50, %v690_v61  ;;  %v706_v20 = vmul.f32 %v1428_v50, %v691_v62  ;;  %v714_v6 = vadd.f32 %v1429_v19, %v699_v63  ;;  %v1126_v62 = vld [vmem:[%s2482_s5 + $0x88] sm:$0xff]  ;;  %v1109_v63 = vld [vmem:[%s2482_s5] sm:$0xff] }
 0x1ab   : > { %v715_v21 = vadd.f32 %v1429_v19, %v700_v0  ;;  %v716_v22 = vadd.f32 %v1429_v19, %v701_v1  ;;  %v717_v5 = vadd.f32 %v1429_v19, %v702_v2  ;;  %v718_v23 = vadd.f32 %v1429_v19, %v703_v3  ;;  %v1110_v0 = vld [vmem:[%s2482_s5 + $0x8] sm:$0xff] }
 0x1ac   : > { %v719_v24 = vadd.f32 %v1429_v19, %v704_v18  ;;  %v720_v8 = vadd.f32 %v1429_v19, %v705_v4  ;;  %v721_v9 = vadd.f32 %v1429_v19, %v706_v20  ;;  %v1157_v18 = vld [vmem:[%s2482_s5 + $0x180] sm:$0xff]  ;;  %v1158_v4 = vld [vmem:[%s2482_s5 + $0x188] sm:$0xff] }
 0x1ad   : > { %v784_v7 = vrot.slane %v715_v21, 7  ;;  %v786_v25 = vrot.slane %v716_v22, 6  ;;  %v788_v11 = vrot.slane %v717_v5, 5  ;;  %v790_v13 = vrot.slane %v718_v23, 4  ;;  %v1141_v19 = vld [vmem:[%s2482_s5 + $0x100] sm:$0xff]  ;;  %v1142_v22 = vld [vmem:[%s2482_s5 + $0x108] sm:$0xff] }
 0x1ae   : > { %v792_v15 = vrot.slane %v719_v24, 3  ;;  %v794_v17 = vrot.slane %v720_v8, 2  ;;  %v796_v27 = vrot.slane %v721_v9, 1  ;;  %v1127_v5 = vld [vmem:[%s2482_s5 + $0x90] sm:$0xff]  ;;  %v1128_v23 = vld [vmem:[%s2482_s5 + $0x98] sm:$0xff] }
 0x1af   : > { %v785_v10 = vsel %vm587_vm2, %v784_v7, %v714_v6  ;;  %v962_v7 = vld [vmem:[%s2484_s7] sm:$0x3]  ;;  %v1159_v8 = vld [vmem:[%s2482_s5 + $0x190] sm:$0xff]  ;;  %v1160_v9 = vld [vmem:[%s2482_s5 + $0x198] sm:$0xff] }
 0x1b0   : > { %v787_v12 = vsel %vm589_vm3, %v786_v25, %v785_v10  ;;  %v1580_v25 = vpack.c.bf16 %v1126_v62, %v1125_v57 }
 0x1b1   : > { %v789_v14 = vsel %vm591_vm4, %v788_v11, %v787_v12  ;;  %v1582_v11 = vpack.c.bf16 %v1110_v0, %v1109_v63  ;;  %v1612_v12 = vpack.c.bf16 %v1158_v4, %v1157_v18  ;;  %v1150_v63 = vld [vmem:[%s2482_s5 + $0x148] sm:$0xff]  ;;  %v1135_v0 = vld [vmem:[%s2482_s5 + $0xd0] sm:$0xff] }
 0x1b2   : > { %v791_v16 = vsel %vm593_vm5, %v790_v13, %v789_v14  ;;  %v1614_v13 = vpack.c.bf16 %v1142_v22, %v1141_v19  ;;  %v1584_v14 = vpack.c.bf16 %v1128_v23, %v1127_v5  ;;  %v1151_v22 = vld [vmem:[%s2482_s5 + $0x150] sm:$0xff]  ;;  %v1152_v23 = vld [vmem:[%s2482_s5 + $0x158] sm:$0xff] }
 0x1b3   : > { %v793_v26 = vsel %vm595_vm6, %v792_v15, %v791_v16  ;;  %v1111_v15 = vld [vmem:[%s2482_s5 + $0x10] sm:$0xff]  ;;  %v1112_v16 = vld [vmem:[%s2482_s5 + $0x18] sm:$0xff] }
 0x1b4   : > { %v795_v28 = vsel %vm597_vm7, %v794_v17, %v793_v26  ;;  %v1143_v17 = vld [vmem:[%s2482_s5 + $0x110] sm:$0xff]  ;;  %v1616_v26 = vpack.c.bf16 %v1160_v9, %v1159_v8  ;;  %v1586_v32 = vpack.c.bf16 %v1112_v16, %v1111_v15  ;;  %v1634_v9 = vpack.c.bf16 %v1152_v23, %v1151_v22  ;;  %v1154_v15 = vld [vmem:[%s2482_s5 + $0x168] sm:$0xff] }
 0x1b5   : > { %v797_v29 = vsel %vm599_vm8, %v796_v27, %v795_v28  ;;  %v1144_v27 = vld [vmem:[%s2482_s5 + $0x118] sm:$0xff]  ;;  %v1129_v28 = vld [vmem:[%s2482_s5 + $0xa0] sm:$0xff]  ;;  %v1139_v16 = vld [vmem:[%s2482_s5 + $0xf0] sm:$0xff] }
 0x1b6   : > { %1430 = vmatmul.mubr.msk.f32.vlgmr.msra.gmra.mrb[0].mxu0 %vm494_vm1, %v797_v29  ;;  %1431 = vmatmul.mubr.msk.f32.vlgmr.msra.gmra.mrb[0].mxu1 %vm494_vm1, %v797_v29  ;;  %v1130_v29 = vld [vmem:[%s2482_s5 + $0xa8] sm:$0xff]  ;;  %v1618_v33 = vpack.c.bf16 %v1144_v27, %v1143_v17  ;;  %v1140_v17 = vld [vmem:[%s2482_s5 + $0xf8] sm:$0xff] }
 0x1b7   : > { %1031 = vmatprep.mubr.f32.mxu0 %v1857_v56  ;;  %1102 = vmatprep.mubr.f32.mxu1 %v1857_v56  ;;  %v1588_v34 = vpack.c.bf16 %v1130_v29, %v1129_v28  ;;  %v1608_v28 = vpack.c.bf16 %v1140_v17, %v1139_v16  ;;  %v1171_v29 = vld [vmem:[%s2482_s5 + $0x1f0] sm:$0xff] }
 0x289   : > { %v866_v41 = vpop.f32.mrb[0].mxu0  ;;  %v937_v42 = vpop.f32.mrb[0].mxu1 }
 0x28a   : > { %v867_v43 = vadd.f32 %v866_v41, %v759_v37  ;;  %v938_v44 = vadd.f32 %v937_v42, %v767_v38  ;;  %v868_v45 = vpop.f32.mrb[1].mxu0  ;;  %v939_v56 = vpop.f32.mrb[1].mxu1  ;;  %v1145_v37 = vld [vmem:[%s2482_s5 + $0x120] sm:$0xff]  ;;  %v1620_v38 = vpack.c.bf16 %v1162_v31, %v1161_v30  ;;  %v1132_v41 = vld [vmem:[%s2482_s5 + $0xb8] sm:$0xff]  ;;  %v1163_v42 = vld [vmem:[%s2482_s5 + $0x1b0] sm:$0xff] }
 0x28b   : > { %v869_v46 = vadd.f32 %v868_v45, %v763_v39  ;;  %v940_v47 = vadd.f32 %v939_v56, %v771_v40  ;;  %v1146_v39 = vld [vmem:[%s2482_s5 + $0x128] sm:$0xff]  ;;  %v1131_v40 = vld [vmem:[%s2482_s5 + $0xb0] sm:$0xff]  ;;  %v1172_v30 = vld [vmem:[%s2482_s5 + $0x1f8] sm:$0xff] }
 0x28c   : > { %v946_v48 = vmul.f32 0.70710677, %v867_v43  ;;  %v948_v49 = vmul.f32 0.70710677, %v938_v44  ;;  %v942_v1 = vmul.f32 0.5, %v867_v43  ;;  %v944_v20 = vmul.f32 0.5, %v938_v44 }
 0x28d   : > { %v947_v50 = vmul.f32 0.70710677, %v869_v46  ;;  %v949_v51 = vmul.f32 0.70710677, %v940_v47  ;;  %v943_v60 = vmul.f32 0.5, %v869_v46  ;;  %v945_v2 = vmul.f32 0.5, %v940_v47 }
 0x28e   : > { %1736 = verf.f32 %v946_v48  ;;  %v1164_v43 = vld [vmem:[%s2482_s5 + $0x1b8] sm:$0xff]  ;;  %v1590_v44 = vpack.c.bf16 %v1114_v36, %v1113_v35  ;;  %v1622_v45 = vpack.c.bf16 %v1146_v39, %v1145_v37  ;;  %v1592_v56 = vpack.c.bf16 %v1132_v41, %v1131_v40  ;;  %v1115_v46 = vld [vmem:[%s2482_s5 + $0x30] sm:$0xff] }
 0x28f   : > { %1738 = verf.f32 %v948_v49  ;;  %v1116_v47 = vld [vmem:[%s2482_s5 + $0x38] sm:$0xff]  ;;  %v1147_v48 = vld [vmem:[%s2482_s5 + $0x130] sm:$0xff]  ;;  %v1624_v49 = vpack.c.bf16 %v1164_v43, %v1163_v42  ;;  %v1434_v43 = vld [vmem:[%s2483_s6] ss:$0 sm:$0xff] }
 0x290   : > { %1740 = verf.f32 %v947_v50  ;;  %v1148_v50 = vld [vmem:[%s2482_s5 + $0x138] sm:$0xff]  ;;  %v1123_v31 = vld [vmem:[%s2482_s5 + $0x70] sm:$0xff] }
 0x291   : > { %1742 = verf.f32 %v949_v51  ;;  %v1133_v51 = vld [vmem:[%s2482_s5 + $0xc0] sm:$0xff]  ;;  %v1626_v57 = vpack.c.bf16 %v1148_v50, %v1147_v48  ;;  %v1156_v36 = vld [vmem:[%s2482_s5 + $0x178] sm:$0xff] }
 0x298   : > { %v1737_v52 = vpop.eup %1736 }
 0x299   : > { %v1739_v53 = vpop.eup %1738  ;;  %v954_v55 = vadd.f32 1.0, %v1737_v52  ;;  %v1134_v52 = vld [vmem:[%s2482_s5 + $0xc8] sm:$0xff] }
 0x29a   : > { %v1741_v54 = vpop.eup %1740  ;;  %v956_v59 = vadd.f32 1.0, %v1739_v53  ;;  %v1165_v53 = vld [vmem:[%s2482_s5 + $0x1c0] sm:$0xff] }
 0x29b   : > { %v1743_v58 = vpop.eup %1742  ;;  %v955_v61 = vadd.f32 1.0, %v1741_v54  ;;  %v958_v6 = vmul.f32 %v954_v55, %v942_v1  ;;  %v1166_v54 = vld [vmem:[%s2482_s5 + $0x1c8] sm:$0xff]  ;;  %v1594_v55 = vpack.c.bf16 %v1116_v47, %v1115_v46  ;;  %v1136_v1 = vld [vmem:[%s2482_s5 + $0xd8] sm:$0xff] }
 0x29c   : > { %v957_v3 = vadd.f32 1.0, %v1743_v58  ;;  %v960_v10 = vmul.f32 %v956_v59, %v944_v20  ;;  %v1596_v58 = vpack.c.bf16 %v1134_v52, %v1133_v51  ;;  %v1117_v59 = vld [vmem:[%s2482_s5 + $0x40] sm:$0xff]  ;;  %v1628_v62 = vpack.c.bf16 %v1166_v54, %v1165_v53  ;;  %v1119_v20 = vld [vmem:[%s2482_s5 + $0x50] sm:$0xff] }
 0x29d   : > { %v959_v21 = vmul.f32 %v955_v61, %v943_v60  ;;  %v1118_v60 = vld [vmem:[%s2482_s5 + $0x48] sm:$0xff]  ;;  %v1149_v61 = vld [vmem:[%s2482_s5 + $0x140] sm:$0xff]  ;;  %v1600_v19 = vpack.c.bf16 %v1136_v1, %v1135_v0 }
 0x29e   : > { %v961_v24 = vmul.f32 %v957_v3, %v945_v2  ;;  %v1167_v2 = vld [vmem:[%s2482_s5 + $0x1d0] sm:$0xff]  ;;  %v1168_v3 = vld [vmem:[%s2482_s5 + $0x1d8] sm:$0xff]  ;;  %v1598_v18 = vpack.c.bf16 %v1118_v60, %v1117_v59  ;;  %v1630_v4 = vpack.c.bf16 %v1150_v63, %v1149_v61 }
 0x29f   : > { %967 = vmatprep.subr.mxu0 %v959_v21  ;;  %v1120_v21 = vld [vmem:[%s2482_s5 + $0x58] sm:$0xff]  ;;  %v1632_v5 = vpack.c.bf16 %v1168_v3, %v1167_v2 }
 0x2a0   : > { %1038 = vmatprep.subr.mxu1 %v961_v24  ;;  %968 = vmatpush1.msra.mxu0 %v958_v6  ;;  %v1137_v6 = vld [vmem:[%s2482_s5 + $0xe0] sm:$0xff]  ;;  %v1138_v24 = vld [vmem:[%s2482_s5 + $0xe8] sm:$0xff]  ;;  %v1602_v8 = vpack.c.bf16 %v1120_v21, %v1119_v20 }
 0x2a1   : > { %1039 = vmatpush1.msra.mxu1 %v960_v10  ;;  %1432 = vmatmul.mubr.msk.f32.vlgmr.msra.gmra.mrb[2].mxu0 %vm963_vm9, %v962_v7  ;;  %v1604_v10 = vpack.c.bf16 %v1138_v24, %v1137_v6 }
 0x2a2   : > { %1433 = vmatmul.mubr.msk.f32.vlgmr.msra.gmra.mrb[2].mxu1 %vm963_vm9, %v962_v7  ;;  %1581 = vmatprep.subr.bf16.mxu0 %v1580_v25  ;;  %v1169_v7 = vld [vmem:[%s2482_s5 + $0x1e0] sm:$0xff]  ;;  %v1170_v25 = vld [vmem:[%s2482_s5 + $0x1e8] sm:$0xff] }
 0x2a3   : > { %1583 = vmatpush3.bf16.msra.mxu0 %v1582_v11  ;;  %1613 = vmatprep.subr.bf16.mxu1 %v1612_v12  ;;  %v1121_v11 = vld [vmem:[%s2482_s5 + $0x60] sm:$0xff]  ;;  %v1122_v12 = vld [vmem:[%s2482_s5 + $0x68] sm:$0xff] }
 0x2a4   : > { %1615 = vmatpush3.bf16.msra.mxu1 %v1614_v13  ;;  %1585 = vmatprep.subr.bf16.mxu0 %v1584_v14  ;;  %v1153_v13 = vld [vmem:[%s2482_s5 + $0x160] sm:$0xff]  ;;  %v1636_v14 = vpack.c.bf16 %v1170_v25, %v1169_v7 }
 0x2a5   : > { %1617 = vmatprep.subr.bf16.mxu1 %v1616_v26  ;;  %v1606_v26 = vpack.c.bf16 %v1122_v12, %v1121_v11  ;;  %v1638_v27 = vpack.c.bf16 %v1154_v15, %v1153_v13 }
 0x2a7   : > { %1587 = vmatpush3.bf16.msra.mxu0 %v1586_v32  ;;  %v1124_v32 = vld [vmem:[%s2482_s5 + $0x78] sm:$0xff] }
 0x2a8   : > { %1619 = vmatpush3.bf16.msra.mxu1 %v1618_v33  ;;  %1589 = vmatprep.subr.bf16.mxu0 %v1588_v34  ;;  %v1640_v33 = vpack.c.bf16 %v1172_v30, %v1171_v29  ;;  %v1155_v34 = vld [vmem:[%s2482_s5 + $0x170] sm:$0xff]  ;;  %v1610_v35 = vpack.c.bf16 %v1124_v32, %v1123_v31 }
 0x2a9   : > { %1621 = vmatprep.subr.bf16.mxu1 %v1620_v38  ;;  %v1642_v37 = vpack.c.bf16 %v1156_v36, %v1155_v34 }
 0x2ab   : > { %1591 = vmatpush3.bf16.msra.mxu0 %v1590_v44 }
 0x2ac   : > { %1623 = vmatpush3.bf16.msra.mxu1 %v1622_v45  ;;  %1593 = vmatprep.subr.bf16.mxu0 %v1592_v56 }
 0x2ad   : > { %1625 = vmatprep.subr.bf16.mxu1 %v1624_v49 }
 0x2af   : > { %1595 = vmatpush3.bf16.msra.mxu0 %v1594_v55 }
 0x2b0   : > { %1627 = vmatpush3.bf16.msra.mxu1 %v1626_v57  ;;  %1597 = vmatprep.subr.bf16.mxu0 %v1596_v58 }
 0x2b1   : > { %1629 = vmatprep.subr.bf16.mxu1 %v1628_v62 }
 0x2b3   : > { %1599 = vmatpush3.bf16.msra.mxu0 %v1598_v18 }
 0x2b4   : > { %1631 = vmatpush3.bf16.msra.mxu1 %v1630_v4  ;;  %1601 = vmatprep.subr.bf16.mxu0 %v1600_v19 }
 0x2b5   : > { %1633 = vmatprep.subr.bf16.mxu1 %v1632_v5 }
 0x2b7   : > { %1603 = vmatpush3.bf16.msra.mxu0 %v1602_v8 }
 0x2b8   : > { %1635 = vmatpush3.bf16.msra.mxu1 %v1634_v9  ;;  %1605 = vmatprep.subr.bf16.mxu0 %v1604_v10 }
 0x2b9   : > { %1637 = vmatprep.subr.bf16.mxu1 %v1636_v14 }
 0x2bb   : > { %1607 = vmatpush3.bf16.msra.mxu0 %v1606_v26 }
 0x2bc   : > { %1639 = vmatpush3.bf16.msra.mxu1 %v1638_v27  ;;  %1609 = vmatprep.subr.bf16.mxu0 %v1608_v28 }
 0x2bd   : > { %1641 = vmatprep.subr.bf16.mxu1 %v1640_v33 }
 0x2bf   : > { %1611 = vmatpush3.bf16.msra.mxu0 %v1610_v35 }
 0x2c0   : > { %1643 = vmatpush3.bf16.msra.mxu1 %v1642_v37 }
 0x374   : > { %v1033_v38 = vpop.f32.mrb[2].mxu0 }
 0x375   : > { %v1035_v39 = vpop.f32.mrb[3].mxu0  ;;  %v1104_v40 = vpop.f32.mrb[2].mxu1 }
 0x376   : > { %1244 = vmatprep.mubr.f32.mxu0 %v1035_v39  ;;  %v1106_v41 = vpop.f32.mrb[3].mxu1 }
 0x377   : > { %1245 = vmatmul.mubr.f32.vlgmr.msra.gmra.mrb[4].mxu0 %v1033_v38  ;;  %1314 = vmatprep.mubr.f32.mxu1 %v1106_v41 }
 0x378   : > { %1315 = vmatmul.mubr.f32.vlgmr.msra.gmra.mrb[4].mxu1 %v1104_v40 }
 0x44a   : > { %v1510_v42 = vpop.f32.mrb[4].mxu0 }
 0x44b   : > { %v1511_v44 = vpop.f32.mrb[5].mxu0  ;;  %v1545_v45 = vpop.f32.mrb[4].mxu1 }
 0x44c   : > { %v1512_v56 = vadd.f32 %v1511_v44, %v1510_v42  ;;  %v1546_v46 = vpop.f32.mrb[5].mxu1 }
 0x44d   : > { %v1547_v47 = vadd.f32 %v1546_v46, %v1545_v45 }
 0x44e   : > { %v1247_v48 = vadd.f32 %v1512_v56, %v1434_v43 }
 0x450   : > { %v1317_v49 = vadd.f32 %v1547_v47, %v1247_v48 }
 0x452   : > { %1320 = vst [vmem:[%s422_s15] sm:$0x3] %v1317_v49 }
 0x453 PF: > { %s1436_s25 = sshll.u32 %s1842_s11, 5  ;;  %s1335_s27 = sshll.u32 %s422_s15, 4  ;;  %s1336_s27 = int_to_ptr.vmem [resolvable:$true] %s1335_s27 }
 0x454   : > { %s2420_s18 = scalar_lea.hbm %s2485_s8, %s1436_s25  ;;  %s2499_s21 = sand.u32 1, %s1822_s28  }
 0x455   : > { %s1322_s16 = scalar_lea.sflag [#allocation5], %s2499_s21  ;;  %s1744_s30 = scalar_lea.vmem %s1336_s27, 32 }
 0x456   : > { %p1745_p5 = scmp.ne.s32.totalorder %s1336_s27, %s1744_s30  ;;  %s1858_s10 = smov [#allocation4]  }
 0x457   : > { %s1748_s20 = sshll.u32 %s1858_s10, 4  ;;  %s1749_s20 = int_to_ptr.vmem [resolvable:$false] %s1748_s20 }
 0x458   : > { %p1746_p6 = pnand %p1745_p5, %p1976_p7  ;;  %s1750_s24 = scalar_lea.vmem %s1749_s20, 64 }
 0x459   : > { %p1751_p9 = scmp.lt.s32.totalorder %s1336_s27, %s1749_s20  ;;  %p1752_p10 = scmp.lt.s32.totalorder %s1750_s24, %s1744_s30 }
 0x45a   : > { %p1747_p8 = pneg %p1746_p6 }
 0x45b   : > { %p1753_p11 = por %p1752_p10, %p1751_p9 }
 0x45d   : > { %p1754_p13 = pnand %p1753_p11, %p1747_p8 }
 0x45f   : > { %1757 = shalt.err (!%p1754_p13)
}
 0x460   : > { %s1758_s11 = scalar_lea.hbm %s2420_s18, 32  ;;  %s1762_s25 = scalar_lea.hbm %s2485_s8, 64 }
 0x461   : > { %p1759_p0 = scmp.ne.s32.totalorder %s2420_s18, %s1758_s11  ;;  %p1763_p3 = scmp.lt.u32.totalorder %s2420_s18, %s2485_s8 }
 0x462   : > { %p1764_p4 = scmp.lt.u32.totalorder %s1762_s25, %s1758_s11  ;;  %p1766_p6 = scmp.lt.u32.totalorder %s1758_s11, %s2420_s18 }
 0x463   : > { %p1760_p1 = pnand %p1759_p0, %p1976_p7 }
 0x464   : > { %p1765_p5 = por %p1764_p4, %p1763_p3 }
 0x465   : > { %p1761_p2 = pneg %p1760_p1 }
 0x466   : > { %p1767_p8 = por %p1766_p6, %p1765_p5 }
 0x468   : > { %p1768_p9 = pnand %p1767_p8, %p1761_p2 }
 0x46a   : > { %1771 = shalt.err (!%p1768_p9)
}
 0x46b   : > { %1645 = dma.vmem_to_hbm [thread:$0]  (%p1976_p7), %s1336_s27, 32, %s2420_s18, %s1322_s16  }
 0x46c PF: > { %s2500_s21 = sld [smem:[#allocation7_spill]]  ;;  %p1651_p10 = scmp.ge.s32.totalorder %s1854_s14, 2 }
 0x46e   : > { %p1648_p11 = pnand %p1651_p10, %p1984_p12 }
 0x472   : > { %s1347_s10 = sand.u32 1, %s2500_s21  }
 0x473   : > { %s1348_s20 = scalar_lea.sflag [#allocation5], %s1347_s10 }
 0x474   : > { %1813 = dma.done.wait (!%p1648_p11), %s1348_s20, 32  }
 0x475   : > { %1815 = vsyncadd (!%p1648_p11), %s1348_s20, 4294967264  ;;  %s21_s14 = sadd.s32 1, %s1854_s14   ;;  %s2502_s23 = sld [smem:[#allocation11_spill]] }
 0x476   : > { %p18_p13 = scmp.ge.s32.totalorder %s21_s14, 26   ;;  %s2503_s18 = sld [smem:[#allocation8_spill]] }
 0x477   : > { %s2504_s16 = sld [smem:[#allocation9_spill]]  ;;  %s2505_s27 = smov %s1822_s28 }
 0x478   : > { %s2506_s28 = smov %s1826_s29  ;;  %s2507_s29 = smov %s1989_s17 }
 0x479   : > { %s2508_s30 = smov %s1834_s9  ;;  %s2510_s10 = smov %s1846_s12 }
 0x47a   : > { %s2511_s11 = smov %s1850_s13  ;;  %20 = sbr.rel (!%p18_p13) target bundleno = 6 (0x6), region = 141 }
 0x47b   : > { %s2509_s9 = smov %s2502_s23 }
 0x47c   : > { %s2512_s12 = smov %s2503_s18 }
 0x47d   : > { %s2513_s13 = smov %s2504_s16 }
 0x481   :  { %1353 = vsyncpa [#allocation5], 1 }
 0x482   :  { %1355 = vsyncpa [#allocation5 + $0x1], 1 }

</bundles_post_ra>
